<compile_context>
chip_gen: v7x
topology: tpu7x:2x2x1
jax: 0.10.0
libtpu: 0.0.40
codegen_flags: <defaults>
</compile_context>

<pallas_src>
import math
import jax
import jax.numpy as jnp
from jax import lax
from jax.experimental import pallas as pl
from jax.experimental.pallas import tpu as pltpu

IN_DIM = 20
HID_DIM = 64
OUT_DIM = 2


def _round_up(n, m):
    return ((n + m - 1) // m) * m


def _cdiv(a, b):
    return (a + b - 1) // b


def _mlp_kernel(x_ref, w1_ref, b1_ref, w2t_ref, b2t_ref, ot_ref):
    # Layer 1 on the MXU, bias + ReLU on the VPU, f32 accumulation.
    x = x_ref[...]
    h = jnp.dot(x, w1_ref[...], preferred_element_type=jnp.float32) + b1_ref[...]
    h = jnp.maximum(h, 0.0).astype(w2t_ref.dtype)
    # Layer 2: (OUT, HID) x (TB, HID), contracting HID on both sides, yields
    # (OUT, TB) directly on the MXU -> lane-dense store, no XLU transpose.
    yt = lax.dot_general(
        w2t_ref[...], h,
        dimension_numbers=(((1,), (1,)), ((), ())),
        preferred_element_type=jnp.float32,
    )
    ot_ref[...] = (yt + b2t_ref[...]).astype(ot_ref.dtype)
    # TODO(synk): if a very large TB ever shows spill traffic, add an inner
    # lax.fori_loop(..., unroll=True) over 512-1024-row sub-chunks here.


def dnn_forward(x, w1, b1, w2, b2, *, block_b=4096, transposed_output=False):
    """x: (B, 20) -> (B, 2) float32 (or (2, B) if transposed_output=True).

    Weights are stored as (in_features, out_features); forward is
    y = relu(x @ W1 + b1) @ W2 + b2, matching PyTorch nn.Linear semantics.
    Compute dtype follows x.dtype (pass bf16 x for the bf16 path); weights are
    cast to match (tiny), biases and accumulation stay f32.
    """
    B = x.shape[0]
    cdt = x.dtype  # never cast x here -- that would add a full HBM pass on x.

    w1c = w1.astype(cdt)
    w2t = jnp.transpose(w2).astype(cdt)               # (OUT_DIM, HID_DIM)
    b1f = b1.reshape(1, HID_DIM).astype(jnp.float32)   # (1, HID)
    b2t = b2.reshape(OUT_DIM, 1).astype(jnp.float32)   # (OUT, 1)

    # Batch tile: multiple of 128 (lane-dense transposed output; covers the
    # bf16 (16,128) min tile), capped by block_b and by the actual batch.
    tb = max(128, min(_round_up(block_b, 128), _round_up(B, 128)))
    # v7x: if the whole (large) batch fits one tile, split in two so the
    # "parallel" batch axis can feed both TensorCores.
    if _cdiv(B, tb) == 1 and tb >= 1024:
        tb = _round_up(_cdiv(B, 2), 128)
    nb = _cdiv(B, tb)
    B_pad = nb * tb
    if B_pad != B:
        x = jnp.pad(x, ((0, B_pad - B), (0, 0)))

    # VMEM footprint with lane padding (x block (tb,20) -> (tb,128) words,
    # h (tb,64) -> (tb,128), out (2,tb) -> (8,tb)); x and out double-buffered.
    bytes_per_word = 4
    x_bufs = 2 * tb * 128 * bytes_per_word
    h_buf = tb * 128 * bytes_per_word
    y_bufs = 2 * 8 * tb * bytes_per_word
    vmem_limit = int(1.5 * (x_bufs + h_buf + y_bufs)) + (2 << 20)
    vmem_limit = max(16 << 20, min(vmem_limit, 48 << 20))

    out_t = pl.pallas_call(
        _mlp_kernel,
        out_shape=jax.ShapeDtypeStruct((OUT_DIM, B_pad), jnp.float32),
        grid=(nb,),
        in_specs=[
            # x: tiled over the batch axis (pipelined against compute).
            pl.BlockSpec((tb, IN_DIM), lambda i: (i, 0)),
            # Weights / biases: constant index_maps -> stay VMEM-resident.
            pl.BlockSpec((IN_DIM, HID_DIM), lambda i: (0, 0)),
            pl.BlockSpec((1, HID_DIM), lambda i: (0, 0)),
            pl.BlockSpec((OUT_DIM, HID_DIM), lambda i: (0, 0)),
            pl.BlockSpec((OUT_DIM, 1), lambda i: (0, 0)),
        ],
        # Lane-dense transposed output: last dim is the batch tile (>=128).
        out_specs=pl.BlockSpec((OUT_DIM, tb), lambda i: (0, i)),
        compiler_params=pltpu.CompilerParams(
            dimension_semantics=("parallel",),
            vmem_limit_bytes=vmem_limit,
        ),
    )(x, w1c, b1f, w2t, b2t)

    out_t = out_t[:, :B]
    if transposed_output:
        return out_t          # (OUT_DIM, B): skips the extra HBM pass.
    return out_t.T            # (B, OUT_DIM): PyTorch layout.


def init_params(key):
    """Deterministic init mirroring PyTorch nn.Linear default:
    U(-1/sqrt(fan_in), 1/sqrt(fan_in)) for both weight and bias."""
    k1, k2, k3, k4 = jax.random.split(key, 4)
    bound1 = 1.0 / math.sqrt(IN_DIM)
    bound2 = 1.0 / math.sqrt(HID_DIM)
    # Stored as (in, out) so forward is x @ W + b.
    w1 = jax.random.uniform(k1, (IN_DIM, HID_DIM), jnp.float32, -bound1, bound1)
    b1 = jax.random.uniform(k2, (1, HID_DIM), jnp.float32, -bound1, bound1)
    w2 = jax.random.uniform(k3, (HID_DIM, OUT_DIM), jnp.float32, -bound2, bound2)
    b2 = jax.random.uniform(k4, (1, OUT_DIM), jnp.float32, -bound2, bound2)
    return w1, b1, w2, b2


if __name__ == "__main__":
    key = jax.random.PRNGKey(0)
    k_x, k_x2, k_p = jax.random.split(key, 3)
    w1, b1, w2, b2 = init_params(k_p)

    # Small batch (single tile, nb=1).
    B = 16
    x = jax.random.normal(k_x, (B, IN_DIM), jnp.float32)
    ref = jnp.maximum(x @ w1 + b1, 0.0) @ w2 + b2
    out = jax.block_until_ready(dnn_forward(x, w1, b1, w2, b2))
    assert out.shape == (B, OUT_DIM)
    assert jnp.allclose(out, ref, atol=1e-5, rtol=1e-5)

    # Batch not a multiple of 128 (exercises padding) + transposed output path.
    B2 = 300
    x2 = jax.random.normal(k_x2, (B2, IN_DIM), jnp.float32)
    ref2 = jnp.maximum(x2 @ w1 + b1, 0.0) @ w2 + b2
    out2_t = jax.block_until_ready(
        dnn_forward(x2, w1, b1, w2, b2, transposed_output=True))
    assert out2_t.shape == (OUT_DIM, B2)
    assert jnp.allclose(out2_t.T, ref2, atol=1e-5, rtol=1e-5)

    # bf16 path: x already stored in bf16 upstream (no wrapper-side cast).
    x_bf16 = x.astype(jnp.bfloat16)
    out_bf16 = jax.block_until_ready(dnn_forward(x_bf16, w1, b1, w2, b2))
    assert out_bf16.shape == (B, OUT_DIM)
    assert jnp.allclose(out_bf16, ref, atol=5e-2, rtol=5e-2)

    print("KERNEL_OK")
</pallas_src>

<mosaic_0001>
module attributes {stable_mosaic.version = 11 : i64} {
  func.func @_mlp_kernel(%arg0: i32, %arg1: memref<128x20xf32, #tpu.memory_space<vmem>>, %arg2: memref<20x64xf32, #tpu.memory_space<vmem>>, %arg3: memref<1x64xf32, #tpu.memory_space<vmem>>, %arg4: memref<2x64xf32, #tpu.memory_space<vmem>>, %arg5: memref<2x1xf32, #tpu.memory_space<vmem>>, %arg6: memref<2x128xf32, #tpu.memory_space<vmem>>) attributes {dimension_semantics = [#tpu.dimension_semantics<parallel>], iteration_bounds = array<i64: 1>, scalar_prefetch = 0 : i64, scratch_operands = 0 : i64, tpu.core_type = #tpu.core_type<tc>, window_params = [{transform_indices = @transform_0, window_bounds = array<i64: 128, 20>}, {pipeline_mode = #tpu.pipeline_mode<synchronous>, transform_indices = @transform_1, window_bounds = array<i64: 20, 64>}, {pipeline_mode = #tpu.pipeline_mode<synchronous>, transform_indices = @transform_2, window_bounds = array<i64: 1, 64>}, {pipeline_mode = #tpu.pipeline_mode<synchronous>, transform_indices = @transform_3, window_bounds = array<i64: 2, 64>}, {pipeline_mode = #tpu.pipeline_mode<synchronous>, transform_indices = @transform_4, window_bounds = array<i64: 2, 1>}, {transform_indices = @transform_5, window_bounds = array<i64: 2, 128>}]} {
    %c0 = arith.constant 0 : index
    %c0_0 = arith.constant 0 : index
    %0 = vector.load %arg1[%c0, %c0_0] : memref<128x20xf32, #tpu.memory_space<vmem>>, vector<128x20xf32>
    %c0_1 = arith.constant 0 : index
    %c0_2 = arith.constant 0 : index
    %1 = vector.load %arg2[%c0_1, %c0_2] : memref<20x64xf32, #tpu.memory_space<vmem>>, vector<20x64xf32>
    %cst = arith.constant dense<0.000000e+00> : vector<128x64xf32>
    %2 = tpu.matmul %0, %1, %cst {dimension_numbers = #tpu.dot_dimension_numbers<[1], [0], [0], [1], [0, 0, 1, 1], [], []>} : vector<128x20xf32>, vector<20x64xf32>, vector<128x64xf32> -> vector<128x64xf32>
    %c0_3 = arith.constant 0 : index
    %c0_4 = arith.constant 0 : index
    %3 = vector.load %arg3[%c0_3, %c0_4] : memref<1x64xf32, #tpu.memory_space<vmem>>, vector<1x64xf32>
    %4 = vector.broadcast %3 : vector<1x64xf32> to vector<128x64xf32>
    %5 = arith.addf %2, %4 : vector<128x64xf32>
    %cst_5 = arith.constant 0.000000e+00 : f32
    %6 = vector.broadcast %cst_5 : f32 to vector<128x64xf32>
    %7 = arith.maximumf %5, %6 : vector<128x64xf32>
    %c0_6 = arith.constant 0 : index
    %c0_7 = arith.constant 0 : index
    %8 = vector.load %arg4[%c0_6, %c0_7] : memref<2x64xf32, #tpu.memory_space<vmem>>, vector<2x64xf32>
    %cst_8 = arith.constant dense<0.000000e+00> : vector<2x128xf32>
    %9 = tpu.matmul %8, %7, %cst_8 {dimension_numbers = #tpu.dot_dimension_numbers<[1], [1], [0], [0], [0, 0, 1, 0], [], []>} : vector<2x64xf32>, vector<128x64xf32>, vector<2x128xf32> -> vector<2x128xf32>
    %c0_9 = arith.constant 0 : index
    %c0_10 = arith.constant 0 : index
    %10 = vector.load %arg5[%c0_9, %c0_10] : memref<2x1xf32, #tpu.memory_space<vmem>>, vector<2x1xf32>
    %11 = vector.broadcast %10 : vector<2x1xf32> to vector<2x128xf32>
    %12 = arith.addf %9, %11 : vector<2x128xf32>
    %c0_11 = arith.constant 0 : index
    %c0_12 = arith.constant 0 : index
    %13 = vector.load %arg6[%c0_11, %c0_12] : memref<2x128xf32, #tpu.memory_space<vmem>>, vector<2x128xf32>
    tpu.vector_store %arg6[%c0_11, %c0_12], %12 {strides = array<i32>} : memref<2x128xf32, #tpu.memory_space<vmem>>, vector<2x128xf32>,
    return
  }
  func.func @transform_0(%arg0: i32) -> (i32, i32) {
    %c0_i32 = arith.constant 0 : i32
    %c0_i32_0 = arith.constant 0 : i32
    return %arg0, %c0_i32 : i32, i32
  }
  func.func @transform_1(%arg0: i32) -> (i32, i32) {
    %c0_i32 = arith.constant 0 : i32
    %c0_i32_0 = arith.constant 0 : i32
    %c0_i32_1 = arith.constant 0 : i32
    return %c0_i32, %c0_i32_0 : i32, i32
  }
  func.func @transform_2(%arg0: i32) -> (i32, i32) {
    %c0_i32 = arith.constant 0 : i32
    %c0_i32_0 = arith.constant 0 : i32
    %c0_i32_1 = arith.constant 0 : i32
    return %c0_i32, %c0_i32_0 : i32, i32
  }
  func.func @transform_3(%arg0: i32) -> (i32, i32) {
    %c0_i32 = arith.constant 0 : i32
    %c0_i32_0 = arith.constant 0 : i32
    %c0_i32_1 = arith.constant 0 : i32
    return %c0_i32, %c0_i32_0 : i32, i32
  }
  func.func @transform_4(%arg0: i32) -> (i32, i32) {
    %c0_i32 = arith.constant 0 : i32
    %c0_i32_0 = arith.constant 0 : i32
    %c0_i32_1 = arith.constant 0 : i32
    return %c0_i32, %c0_i32_0 : i32, i32
  }
  func.func @transform_5(%arg0: i32) -> (i32, i32) {
    %c0_i32 = arith.constant 0 : i32
    %c0_i32_0 = arith.constant 0 : i32
    return %c0_i32, %arg0 : i32, i32
  }
}

</mosaic_0001>

<bundles_post_ra>
// kernel: tpu_custom_call.1
= control target key start
LH: loop header
LB: loop body
LE: loop exit
PB: predicated region body
PF: predicated region fallthrough
CT: control target
= control target key end

     0   :  { %vm47_vm0 = vcmask 162816   ;;  %vm96_vm1 = vcmask 1043456   ;;  %s767_s0 = inlined_call_operand.vmem [shape: f32[128,20], index: 0, kind: input, shape index: {}]   ;;  %s768_s1 = inlined_call_operand.vmem [shape: f32[20,64], index: 1, kind: input, shape index: {}]   ;;  %s769_s2 = inlined_call_operand.vmem [shape: f32[1,64], index: 2, kind: input, shape index: {}]   ;;  %s770_s3 = inlined_call_operand.vmem [shape: f32[2,64], index: 3, kind: input, shape index: {}]   ;;  %s771_s4 = inlined_call_operand.vmem [shape: f32[2,1], index: 4, kind: input, shape index: {}]   ;;  %s772_s5 = inlined_call_operand.hbm [shape: f32[2,128], index: 5, kind: output, shape index: {}]  }
   0x1   :  { %v37_v0 = vld [vmem:[%s768_s1] sm:$0xff]  ;;  %v38_v1 = vld [vmem:[%s768_s1 + $0x8] sm:$0xff]  ;;  %v39_v4 = vld [vmem:[%s768_s1 + $0x10] sm:$0xf] }
   0x2   :  { %v541_v2 = vpack.c.bf16 %v38_v1, %v37_v0  ;;  %v21_v3 = vld [vmem:[%s767_s0] sm:$0xff]  ;;  %v22_v5 = vld [vmem:[%s767_s0 + $0x8] sm:$0xff] }
   0x3   :  { %482 = vmatprep.mubr.msk.f32.mxu0 %vm47_vm0, %v21_v3 }
   0x4   :  { %542 = vmatprep.subr.bf16.mxu0 %v541_v2 }
   0x5   :  { %544 = vmatpush3.bf16.msra.mxu0 %v541_v2 }
   0x6   :  { %480 = vmatprep.subr.msk.mxu0 %vm96_vm1, %v39_v4 }
   0x7   :  { %10 = vsyncpa [#allocation3], 0  ;;  %v23_v6 = vld [vmem:[%s767_s0 + $0x10] sm:$0xff]  ;;  %v24_v7 = vld [vmem:[%s767_s0 + $0x18] sm:$0xff]  ;;  %v607_v20 = vmov 0.0|0.0   ;;  %vm608_vm2 = vmmov 0  }
   0x8   :  { %v25_v8 = vld [vmem:[%s767_s0 + $0x20] sm:$0xff]  ;;  %v26_v9 = vld [vmem:[%s767_s0 + $0x28] sm:$0xff]  ;;  %v27_v10 = vld [vmem:[%s767_s0 + $0x30] sm:$0xff]  ;;  %545 = vmatprep.subr.bf16.mxu1 %v607_v20  ;;  %v609_v21 = vmov 0.0   ;;  %v610_v23 = vmov 0   ;;  %vm268_vm3 = vcmask 523264  }
   0x9   :  { %481 = vmatpush3.msk.msra.mxu0 %vm96_vm1, %v39_v4  ;;  %v28_v11 = vld [vmem:[%s767_s0 + $0x38] sm:$0xff]  ;;  %v29_v12 = vld [vmem:[%s767_s0 + $0x40] sm:$0xff]  ;;  %v30_v13 = vld [vmem:[%s767_s0 + $0x48] sm:$0xff]  ;;  %538 = vmatprep.mubr.msk.f32.mxu1 %vm608_vm2, %v609_v21 }
   0xa   :  { %483 = vmatmul.mubr.msk.f32.vlgmr.msra.gmra.mrb[0].mxu0 %vm47_vm0, %v22_v5  ;;  %v31_v14 = vld [vmem:[%s767_s0 + $0x50] sm:$0xff]  ;;  %v32_v15 = vld [vmem:[%s767_s0 + $0x58] sm:$0xff]  ;;  %v33_v16 = vld [vmem:[%s767_s0 + $0x60] sm:$0xff]  ;;  %582 = vset.pattern.permute.xlu0 %v610_v23 }
   0xb   :  { %485 = vmatprep.mubr.msk.f32.mxu0 %vm47_vm0, %v23_v6  ;;  %v34_v17 = vld [vmem:[%s767_s0 + $0x68] sm:$0xff]  ;;  %v35_v18 = vld [vmem:[%s767_s0 + $0x70] sm:$0xff]  ;;  %v36_v19 = vld [vmem:[%s767_s0 + $0x78] sm:$0xff] }
   0xc   :  { %v262_v22 = vld [vmem:[%s771_s4] sm:$0x3]  ;;  %vm724_vm4 = vmpackc.low %vm268_vm3, %vm268_vm3  ;;  %s611_s4 = smov [#allocation2]  }
   0xd   :  { %265 = vperm.xlu0 %582, %v262_v22   ;;  %v405_v24 = vld [vmem:[%s769_s2] ss:$0 sm:$0xff]  ;;  %s397_s8 = sshll.u32 %s611_s4, 4  ;;  %s398_s8 = int_to_ptr.vmem [resolvable:$true] %s397_s8 }
   0xe   :  { %486 = vmatmul.mubr.msk.f32.gmra.mrb[2].mxu0 %vm47_vm0, %v24_v7  ;;  %s583_s9 = scalar_lea.vmem %s398_s8, 32  ;;  %p588_p1 = scmp.lt.s32.totalorder %s398_s8, %s398_s8 }
   0xf   :  { %488 = vmatprep.mubr.msk.f32.mxu0 %vm47_vm0, %v25_v8  ;;  %p584_p0 = scmp.ne.s32.totalorder %s398_s8, %s583_s9  ;;  %p589_p2 = scmp.lt.s32.totalorder %s583_s9, %s583_s9 }
  0x11   :  { %p590_p3 = por %p589_p2, %p588_p1 }
  0x12   :  { %489 = vmatmul.mubr.msk.f32.gmra.mrb[4].mxu0 %vm47_vm0, %v26_v9 }
  0x13   :  { %491 = vmatprep.mubr.msk.f32.mxu0 %vm47_vm0, %v27_v10  ;;  %p591_p4 = pnand %p590_p3, %p584_p0 }
  0x16   :  { %492 = vmatmul.mubr.msk.f32.gmra.mrb[6].mxu0 %vm47_vm0, %v28_v11 }
  0x17   :  { %494 = vmatprep.mubr.msk.f32.mxu0 %vm47_vm0, %v29_v12 }
  0x1a   :  { %495 = vmatmul.mubr.msk.f32.gmra.mrb[8].mxu0 %vm47_vm0, %v30_v13 }
  0x1b   :  { %497 = vmatprep.mubr.msk.f32.mxu0 %vm47_vm0, %v31_v14 }
  0x1e   :  { %498 = vmatmul.mubr.msk.f32.gmra.mrb[10].mxu0 %vm47_vm0, %v32_v15 }
  0x1f   :  { %500 = vmatprep.mubr.msk.f32.mxu0 %vm47_vm0, %v33_v16 }
  0x22   :  { %501 = vmatmul.mubr.msk.f32.gmra.mrb[12].mxu0 %vm47_vm0, %v34_v17 }
  0x23   :  { %503 = vmatprep.mubr.msk.f32.mxu0 %vm47_vm0, %v35_v18  ;;  %v261_v18 = vld [vmem:[%s770_s3] sm:$0x3] }
  0x26   :  { %504 = vmatmul.mubr.msk.f32.gmra.mrb[14].mxu0 %vm47_vm0, %v36_v19 }
  0x8c   :  { %v266_v19 = vpop.permute.xlu0 %265 }
  0xdd   :  { %v484_v25 = vpop.f32.mrb[0].mxu0 }
  0xde   :  { %v172_v26 = vadd.f32 %v484_v25, %v405_v24  ;;  %v166_v27 = vpop.f32.mrb[1].mxu0 }
  0xdf   :  { %v167_v28 = vadd.f32 %v405_v24, %v166_v27 }
  0xe0   :  { %v246_v29 = vmax.f32 %v172_v26, 0.0 }
  0xe1   :  { %v245_v30 = vmax.f32 %v167_v28, 0.0  ;;  %v487_v31 = vpop.f32.mrb[2].mxu0 }
  0xe2   :  { %v182_v32 = vadd.f32 %v487_v31, %v405_v24  ;;  %v176_v33 = vpop.f32.mrb[3].mxu0 }
  0xe3   :  { %v546_v35 = vpack.c.bf16 %v246_v29, %v245_v30  ;;  %v177_v36 = vadd.f32 %v405_v24, %v176_v33 }
  0xe4   :  { %v248_v37 = vmax.f32 %v182_v32, 0.0 }
  0xe5   :  { %v247_v38 = vmax.f32 %v177_v36, 0.0  ;;  %548 = vmatpush3.bf16.xpose.msk.msra.mxu1 %vm724_vm4, %v546_v35  ;;  %v490_v39 = vpop.f32.mrb[4].mxu0 }
  0xe6   :  { %v192_v40 = vadd.f32 %v490_v39, %v405_v24  ;;  %549 = vmatprep.subr.bf16.mxu1 %v607_v20  ;;  %v186_v41 = vpop.f32.mrb[5].mxu0 }
  0xe7   :  { %v550_v42 = vpack.c.bf16 %v248_v37, %v247_v38  ;;  %v187_v43 = vadd.f32 %v405_v24, %v186_v41 }
  0xe8   :  { %v250_v44 = vmax.f32 %v192_v40, 0.0 }
  0xe9   :  { %v249_v45 = vmax.f32 %v187_v43, 0.0  ;;  %v493_v46 = vpop.f32.mrb[6].mxu0 }
  0xea   :  { %v202_v47 = vadd.f32 %v493_v46, %v405_v24  ;;  %v196_v48 = vpop.f32.mrb[7].mxu0 }
  0xeb   :  { %v554_v49 = vpack.c.bf16 %v250_v44, %v249_v45  ;;  %v197_v50 = vadd.f32 %v405_v24, %v196_v48 }
  0xec   :  { %v252_v51 = vmax.f32 %v202_v47, 0.0 }
  0xed   :  { %552 = vmatpush3.bf16.xpose.msk.msra.mxu1 %vm724_vm4, %v550_v42  ;;  %v251_v52 = vmax.f32 %v197_v50, 0.0  ;;  %v496_v53 = vpop.f32.mrb[8].mxu0 }
  0xee   :  { %553 = vmatprep.subr.bf16.mxu1 %v607_v20  ;;  %v212_v54 = vadd.f32 %v496_v53, %v405_v24  ;;  %v206_v55 = vpop.f32.mrb[9].mxu0 }
  0xef   :  { %v558_v56 = vpack.c.bf16 %v252_v51, %v251_v52  ;;  %v207_v57 = vadd.f32 %v405_v24, %v206_v55 }
  0xf0   :  { %v254_v58 = vmax.f32 %v212_v54, 0.0 }
  0xf1   :  { %v253_v59 = vmax.f32 %v207_v57, 0.0  ;;  %v499_v60 = vpop.f32.mrb[10].mxu0 }
  0xf2   :  { %v222_v61 = vadd.f32 %v499_v60, %v405_v24  ;;  %v216_v62 = vpop.f32.mrb[11].mxu0 }
  0xf3   :  { %v562_v63 = vpack.c.bf16 %v254_v58, %v253_v59  ;;  %v217_v0 = vadd.f32 %v405_v24, %v216_v62 }
  0xf4   :  { %v256_v1 = vmax.f32 %v222_v61, 0.0 }
  0xf5   :  { %556 = vmatpush3.bf16.xpose.msk.msra.mxu1 %vm724_vm4, %v554_v49  ;;  %v255_v2 = vmax.f32 %v217_v0, 0.0  ;;  %v502_v3 = vpop.f32.mrb[12].mxu0 }
  0xf6   :  { %557 = vmatprep.subr.bf16.mxu1 %v607_v20  ;;  %v232_v4 = vadd.f32 %v502_v3, %v405_v24  ;;  %v226_v5 = vpop.f32.mrb[13].mxu0 }
  0xf7   :  { %v566_v6 = vpack.c.bf16 %v256_v1, %v255_v2  ;;  %v227_v7 = vadd.f32 %v405_v24, %v226_v5 }
  0xf8   :  { %v258_v8 = vmax.f32 %v232_v4, 0.0 }
  0xf9   :  { %v257_v9 = vmax.f32 %v227_v7, 0.0  ;;  %v505_v10 = vpop.f32.mrb[14].mxu0 }
  0xfa   :  { %v242_v11 = vadd.f32 %v505_v10, %v405_v24  ;;  %v236_v12 = vpop.f32.mrb[15].mxu0 }
  0xfb   :  { %v570_v13 = vpack.c.bf16 %v258_v8, %v257_v9  ;;  %v237_v14 = vadd.f32 %v405_v24, %v236_v12 }
  0xfc   :  { %v260_v15 = vmax.f32 %v242_v11, 0.0 }
  0xfd   :  { %560 = vmatpush3.bf16.xpose.msk.msra.mxu1 %vm724_vm4, %v558_v56  ;;  %v259_v16 = vmax.f32 %v237_v14, 0.0 }
  0xfe   :  { %561 = vmatprep.subr.bf16.mxu1 %v607_v20 }
  0xff   :  { %v574_v17 = vpack.c.bf16 %v260_v15, %v259_v16 }
 0x105   :  { %564 = vmatpush3.bf16.xpose.msk.msra.mxu1 %vm724_vm4, %v562_v63 }
 0x106   :  { %565 = vmatprep.subr.bf16.mxu1 %v607_v20 }
 0x10d   :  { %568 = vmatpush3.bf16.xpose.msk.msra.mxu1 %vm724_vm4, %v566_v6 }
 0x10e   :  { %569 = vmatprep.subr.bf16.mxu1 %v607_v20 }
 0x115   :  { %572 = vmatpush3.bf16.xpose.msk.msra.mxu1 %vm724_vm4, %v570_v13 }
 0x116   :  { %573 = vmatprep.subr.bf16.mxu1 %v607_v20 }
 0x11d   :  { %576 = vmatpush3.bf16.xpose.msk.msra.mxu1 %vm724_vm4, %v574_v17 }
 0x124   :  { %539 = vmatmul.mubr.msk.f32.vlgmr.msra.gmra.mrb[0].mxu1 %vm268_vm3, %v261_v18 }
 0x1f7   :  { %v386_v21 = vpop.f32.mrb[0].mxu1 }
 0x1f8   :  { %v387_v22 = vadd.f32 %v386_v21, %v266_v19  ;;  %v540_v23 = vpop.f32.mrb[1].mxu1 }
 0x1fa   :  { %390 = vst [vmem:[#allocation2] sm:$0x3] %v387_v22 }
 0x1fb   :  { %594 = shalt.err (!%p591_p4)
}
 0x1fc   :  { %s595_s3 = scalar_lea.hbm %s772_s5, 32 }
 0x1fd   :  { %p596_p5 = scmp.ne.s32.totalorder %s772_s5, %s595_s3  ;;  %p599_p6 = scmp.lt.u32.totalorder %s595_s3, %s772_s5 }
 0x1ff   :  { %p601_p7 = pnand %p599_p6, %p596_p5 }
 0x201   :  { %604 = shalt.err (!%p601_p7)
}
 0x202   :  { %400 = dma.vmem_to_hbm [thread:$0]  %s398_s8, 32, %s772_s5, [#allocation3]  }
 0x203   :  { %605 = dma.done.wait [#allocation3], 32  }
 0x204   :  { %606 = vsyncadd [#allocation3], 4294967264 }
 0x205   :  { %404 = vsyncpa [#allocation3], 1 }

</bundles_post_ra>
